<compile_context>
chip_gen: v7x
topology: tpu7x:2x2x1
jax: 0.10.0
libtpu: 0.0.40
codegen_flags: <defaults>
</compile_context>

<pallas_src>
import functools
import math

import jax
import jax.numpy as jnp
from jax.experimental import pallas as pl
from jax.experimental.pallas import tpu as pltpu

_LANE = 128      # feature dims of hidden/output layers padded to the 128-lane width
_SUBLANE = 8     # batch tiles are multiples of the 8-row sublane height


def _round_up(x: int, m: int) -> int:
    return ((x + m - 1) // m) * m


def _fused_mlp_kernel(*refs, n_layers: int):
    """x -> [Linear -> ReLU]*(n-1) -> Linear, fully fused in one kernel body.

    refs = (x_ref, w0_ref, [wslab_ref,] bslab_ref, o_ref)
      x_ref     : (tb, din)            activations (param dtype, din unpadded)
      w0_ref    : (din, P)             first-layer weight
      wslab_ref : (n_layers-1, P, P)   remaining weights, zero-padded to common P
      bslab_ref : (n_layers, 1, P)     all biases
    Matmuls accumulate in f32 on the MXU; bias-add / ReLU run in f32 (safe on
    v5e, whose VPU has no bf16).
    """
    x_ref = refs[0]
    w0_ref = refs[1]
    wslab_ref = refs[2] if n_layers > 1 else None
    bslab_ref = refs[3] if n_layers > 1 else refs[2]
    o_ref = refs[-1]

    h = jnp.dot(x_ref[...], w0_ref[...], preferred_element_type=jnp.float32)
    h = h + bslab_ref[0].astype(jnp.float32)
    for i in range(1, n_layers):
        h = jnp.maximum(h, 0.0)                               # ReLU between Linears only
        h = jnp.dot(h.astype(w0_ref.dtype), wslab_ref[i - 1],
                    preferred_element_type=jnp.float32)
        h = h + bslab_ref[i].astype(jnp.float32)
    o_ref[...] = h.astype(o_ref.dtype)


def init_q_network_params(key, layers, dtype=jnp.float32):
    """nn.Linear-style U(-1/sqrt(fan_in), 1/sqrt(fan_in)) init + one-time packing.

    Packing (host side, once):
      w0     : (din, P)            -- input feature dim kept UNpadded
      w_slab : (n_layers-1, P, P)  -- layers 1..n-1, zero-padded to a common P
      b_slab : (n_layers, 1, P)
    with P = max(round_up(d, 128) for d in layers[1:]). Zero padding keeps the
    real (batch, out_dim) window exact. Returns (packed, raw); `raw` is only
    used for the pure-JAX reference check.
    """
    n_layers = len(layers) - 1
    assert n_layers >= 1
    P = max(_round_up(int(d), _LANE) for d in layers[1:])
    ws, bs, raw = [], [], []
    for idx in range(n_layers):
        fan_in, fan_out = int(layers[idx]), int(layers[idx + 1])
        key, kw, kb = jax.random.split(key, 3)
        bound = 1.0 / math.sqrt(fan_in)
        w = jax.random.uniform(kw, (fan_in, fan_out), jnp.float32, -bound, bound)
        b = jax.random.uniform(kb, (fan_out,), jnp.float32, -bound, bound)
        raw.append((w, b))
        in_p = fan_in if idx == 0 else P
        ws.append(jnp.zeros((in_p, P), jnp.float32).at[:fan_in, :fan_out].set(w).astype(dtype))
        bs.append(jnp.zeros((1, P), jnp.float32).at[0, :fan_out].set(b).astype(dtype))
    packed = {
        "layers": tuple(int(d) for d in layers),
        "w0": ws[0],
        "w_slab": jnp.stack(ws[1:], axis=0) if n_layers > 1 else None,
        "b_slab": jnp.stack(bs, axis=0),
    }
    return packed, raw


def q_network_forward(packed, state, *, batch_tile=2048):
    """Forward pass of Q_Network as a single fused pallas_call.

    state: (batch, layers[0]). Returns (batch, layers[-1]) in the param dtype.
    """
    layers = packed["layers"]
    n_layers = len(layers) - 1
    din, out_dim = layers[0], layers[-1]
    w0, w_slab, b_slab = packed["w0"], packed["w_slab"], packed["b_slab"]
    P = w0.shape[1]
    dtype = w0.dtype

    batch = state.shape[0]
    assert state.shape[1] == din
    x = state.astype(dtype)          # no feature / batch padding: passed as-is

    # Batch tile: multiple of the 8-row sublane height, capped for VMEM, and
    # chosen so batch > 8 yields >= 2 grid steps (keeps v7x's 2nd TC busy).
    if batch > _SUBLANE:
        tb = min(batch_tile, _round_up((batch + 1) // 2, _SUBLANE))
    else:
        tb = _SUBLANE
    grid = (pl.cdiv(batch, tb),)     # ragged last block: OOB rows masked on store

    itemsize = jnp.dtype(dtype).itemsize
    param_bytes = (w0.size + b_slab.size
                   + (w_slab.size if w_slab is not None else 0)) * itemsize
    est = (2 * tb * din * itemsize          # double-buffered input blocks
           + 2 * tb * P * itemsize          # double-buffered output blocks
           + 2 * param_bytes                # resident weights/biases
           + 4 * tb * P * 4)                # f32 intermediates headroom
    vmem_limit = int(min(64 << 20, max(32 << 20, 2 * est)))   # v5e default is only 16 MiB

    vmem = pltpu.MemorySpace.VMEM
    in_specs = [
        pl.BlockSpec((tb, din), lambda i: (i, 0), memory_space=vmem),
        # Constant index_maps -> params are DMA'd once and stay resident in VMEM.
        pl.BlockSpec(w0.shape, lambda i: (0, 0), memory_space=vmem),
    ]
    inputs = [x, w0]
    if n_layers > 1:
        in_specs.append(pl.BlockSpec(w_slab.shape, lambda i: (0, 0, 0), memory_space=vmem))
        inputs.append(w_slab)
    in_specs.append(pl.BlockSpec(b_slab.shape, lambda i: (0, 0, 0), memory_space=vmem))
    inputs.append(b_slab)

    out = pl.pallas_call(
        functools.partial(_fused_mlp_kernel, n_layers=n_layers),
        out_shape=jax.ShapeDtypeStruct((batch, P), dtype),
        grid=grid,
        in_specs=in_specs,
        out_specs=pl.BlockSpec((tb, P), lambda i: (i, 0), memory_space=vmem),
        compiler_params=pltpu.CompilerParams(
            dimension_semantics=("parallel",),     # shards batch tiles on v7x's 2 TCs
            vmem_limit_bytes=vmem_limit),
    )(*inputs)

    # Lane-dense (batch, P) result; consumers that can fuse may take `out`
    # directly to avoid the extra slice pass. (For repeated tiny-batch eval,
    # a cross-call resident-weight scheme would amortize the weight DMAs.)
    return out[:, :out_dim]


if __name__ == "__main__":
    layers = [16, 32, 32, 4]         # Q_Network(layers=[16, 32, 32, 4])
    batch = 2

    root = jax.random.PRNGKey(0)
    kparam, kx = jax.random.split(root)
    state = jax.random.normal(kx, (batch, layers[0]), jnp.float32)

    # Pure-JAX reference on the unpadded f32 params.
    packed_f32, raw = init_q_network_params(kparam, layers, dtype=jnp.float32)
    ref = state
    for idx, (w, b) in enumerate(raw):
        ref = ref @ w + b
        if idx + 1 < len(raw):
            ref = jnp.maximum(ref, 0.0)

    # f32 path: exact.
    out = jax.block_until_ready(q_network_forward(packed_f32, state))
    assert out.shape == (batch, layers[-1])
    assert jnp.allclose(out, ref, atol=1e-5, rtol=1e-5)

    # bf16 storage / f32 accumulation path: halves HBM traffic on v6e/v7x.
    packed_bf16, _ = init_q_network_params(kparam, layers, dtype=jnp.bfloat16)
    out_bf16 = jax.block_until_ready(q_network_forward(packed_bf16, state))
    assert out_bf16.shape == (batch, layers[-1])
    assert jnp.allclose(out_bf16.astype(jnp.float32), ref, atol=5e-2, rtol=5e-2)

    print("KERNEL_OK")
</pallas_src>

<mosaic_0001>
module attributes {stable_mosaic.version = 11 : i64} {
  func.func @_fused_mlp_kernel(%arg0: i32, %arg1: memref<8x16xf32, #tpu.memory_space<vmem>>, %arg2: memref<16x128xf32, #tpu.memory_space<vmem>>, %arg3: memref<2x128x128xf32, #tpu.memory_space<vmem>>, %arg4: memref<3x1x128xf32, #tpu.memory_space<vmem>>, %arg5: memref<8x128xf32, #tpu.memory_space<vmem>>) attributes {dimension_semantics = [#tpu.dimension_semantics<parallel>], iteration_bounds = array<i64: 1>, scalar_prefetch = 0 : i64, scratch_operands = 0 : i64, tpu.core_type = #tpu.core_type<tc>, window_params = [{transform_indices = @transform_0, window_bounds = array<i64: 8, 16>}, {pipeline_mode = #tpu.pipeline_mode<synchronous>, transform_indices = @transform_1, window_bounds = array<i64: 16, 128>}, {pipeline_mode = #tpu.pipeline_mode<synchronous>, transform_indices = @transform_2, window_bounds = array<i64: 2, 128, 128>}, {pipeline_mode = #tpu.pipeline_mode<synchronous>, transform_indices = @transform_3, window_bounds = array<i64: 3, 1, 128>}, {transform_indices = @transform_4, window_bounds = array<i64: 8, 128>}]} {
    %c0 = arith.constant 0 : index
    %c0_0 = arith.constant 0 : index
    %0 = vector.load %arg1[%c0, %c0_0] : memref<8x16xf32, #tpu.memory_space<vmem>>, vector<8x16xf32>
    %c0_1 = arith.constant 0 : index
    %c0_2 = arith.constant 0 : index
    %1 = vector.load %arg2[%c0_1, %c0_2] : memref<16x128xf32, #tpu.memory_space<vmem>>, vector<16x128xf32>
    %cst = arith.constant dense<0.000000e+00> : vector<8x128xf32>
    %2 = tpu.matmul %0, %1, %cst {dimension_numbers = #tpu.dot_dimension_numbers<[1], [0], [0], [1], [0, 0, 1, 1], [], []>} : vector<8x16xf32>, vector<16x128xf32>, vector<8x128xf32> -> vector<8x128xf32>
    %c0_3 = arith.constant 0 : index
    %c0_4 = arith.constant 0 : index
    %c0_5 = arith.constant 0 : index
    %3 = vector.load %arg4[%c0_3, %c0_4, %c0_5] : memref<3x1x128xf32, #tpu.memory_space<vmem>>, vector<1x1x128xf32>
    %4 = vector.shape_cast %3 : vector<1x1x128xf32> to vector<1x128xf32>
    %5 = vector.broadcast %4 : vector<1x128xf32> to vector<8x128xf32>
    %6 = arith.addf %2, %5 : vector<8x128xf32>
    %cst_6 = arith.constant 0.000000e+00 : f32
    %7 = vector.broadcast %cst_6 : f32 to vector<8x128xf32>
    %8 = arith.maximumf %6, %7 : vector<8x128xf32>
    %c0_7 = arith.constant 0 : index
    %c0_8 = arith.constant 0 : index
    %c0_9 = arith.constant 0 : index
    %9 = vector.load %arg3[%c0_7, %c0_8, %c0_9] : memref<2x128x128xf32, #tpu.memory_space<vmem>>, vector<1x128x128xf32>
    %10 = vector.shape_cast %9 : vector<1x128x128xf32> to vector<128x128xf32>
    %cst_10 = arith.constant dense<0.000000e+00> : vector<8x128xf32>
    %11 = tpu.matmul %8, %10, %cst_10 {dimension_numbers = #tpu.dot_dimension_numbers<[1], [0], [0], [1], [0, 0, 1, 1], [], []>} : vector<8x128xf32>, vector<128x128xf32>, vector<8x128xf32> -> vector<8x128xf32>
    %c1 = arith.constant 1 : index
    %c0_11 = arith.constant 0 : index
    %c0_12 = arith.constant 0 : index
    %12 = vector.load %arg4[%c1, %c0_11, %c0_12] : memref<3x1x128xf32, #tpu.memory_space<vmem>>, vector<1x1x128xf32>
    %13 = vector.shape_cast %12 : vector<1x1x128xf32> to vector<1x128xf32>
    %14 = vector.broadcast %13 : vector<1x128xf32> to vector<8x128xf32>
    %15 = arith.addf %11, %14 : vector<8x128xf32>
    %cst_13 = arith.constant 0.000000e+00 : f32
    %16 = vector.broadcast %cst_13 : f32 to vector<8x128xf32>
    %17 = arith.maximumf %15, %16 : vector<8x128xf32>
    %c1_14 = arith.constant 1 : index
    %c0_15 = arith.constant 0 : index
    %c0_16 = arith.constant 0 : index
    %18 = vector.load %arg3[%c1_14, %c0_15, %c0_16] : memref<2x128x128xf32, #tpu.memory_space<vmem>>, vector<1x128x128xf32>
    %19 = vector.shape_cast %18 : vector<1x128x128xf32> to vector<128x128xf32>
    %cst_17 = arith.constant dense<0.000000e+00> : vector<8x128xf32>
    %20 = tpu.matmul %17, %19, %cst_17 {dimension_numbers = #tpu.dot_dimension_numbers<[1], [0], [0], [1], [0, 0, 1, 1], [], []>} : vector<8x128xf32>, vector<128x128xf32>, vector<8x128xf32> -> vector<8x128xf32>
    %c2 = arith.constant 2 : index
    %c0_18 = arith.constant 0 : index
    %c0_19 = arith.constant 0 : index
    %21 = vector.load %arg4[%c2, %c0_18, %c0_19] : memref<3x1x128xf32, #tpu.memory_space<vmem>>, vector<1x1x128xf32>
    %22 = vector.shape_cast %21 : vector<1x1x128xf32> to vector<1x128xf32>
    %23 = vector.broadcast %22 : vector<1x128xf32> to vector<8x128xf32>
    %24 = arith.addf %20, %23 : vector<8x128xf32>
    %c0_20 = arith.constant 0 : index
    %c0_21 = arith.constant 0 : index
    %25 = vector.load %arg5[%c0_20, %c0_21] : memref<8x128xf32, #tpu.memory_space<vmem>>, vector<8x128xf32>
    tpu.vector_store %arg5[%c0_20, %c0_21], %24 {strides = array<i32>} : memref<8x128xf32, #tpu.memory_space<vmem>>, vector<8x128xf32>,
    return
  }
  func.func @transform_0(%arg0: i32) -> (i32, i32) {
    %c0_i32 = arith.constant 0 : i32
    %c0_i32_0 = arith.constant 0 : i32
    return %arg0, %c0_i32 : i32, i32
  }
  func.func @transform_1(%arg0: i32) -> (i32, i32) {
    %c0_i32 = arith.constant 0 : i32
    %c0_i32_0 = arith.constant 0 : i32
    %c0_i32_1 = arith.constant 0 : i32
    return %c0_i32, %c0_i32_0 : i32, i32
  }
  func.func @transform_2(%arg0: i32) -> (i32, i32, i32) {
    %c0_i32 = arith.constant 0 : i32
    %c0_i32_0 = arith.constant 0 : i32
    %c0_i32_1 = arith.constant 0 : i32
    %c0_i32_2 = arith.constant 0 : i32
    return %c0_i32, %c0_i32_0, %c0_i32_1 : i32, i32, i32
  }
  func.func @transform_3(%arg0: i32) -> (i32, i32, i32) {
    %c0_i32 = arith.constant 0 : i32
    %c0_i32_0 = arith.constant 0 : i32
    %c0_i32_1 = arith.constant 0 : i32
    %c0_i32_2 = arith.constant 0 : i32
    return %c0_i32, %c0_i32_0, %c0_i32_1 : i32, i32, i32
  }
  func.func @transform_4(%arg0: i32) -> (i32, i32) {
    %c0_i32 = arith.constant 0 : i32
    %c0_i32_0 = arith.constant 0 : i32
    return %arg0, %c0_i32 : i32, i32
  }
}

</mosaic_0001>

<bundles_post_ra>
// kernel: tpu_custom_call.1
= control target key start
LH: loop header
LB: loop body
LE: loop exit
PB: predicated region body
PF: predicated region fallthrough
CT: control target
= control target key end

     0   :  { %9 = vsyncpa [#allocation3], 0  ;;  %s754_s0 = inlined_call_operand.hbm [shape: f32[2,16], index: 0, kind: input, shape index: {}]   ;;  %s755_s1 = inlined_call_operand.hbm [shape: f32[16,128], index: 1, kind: input, shape index: {}]   ;;  %s756_s2 = inlined_call_operand.hbm [shape: f32[2,128,128], index: 2, kind: input, shape index: {}]   ;;  %s757_s3 = inlined_call_operand.vmem [shape: f32[3,1,128], index: 3, kind: input, shape index: {}]   ;;  %s758_s4 = inlined_call_operand.hbm [shape: f32[2,128], index: 4, kind: output, shape index: {}]  }
   0x1   :  { %10 = vsyncpa [#allocation6], 0 }
   0x2   :  { %11 = vsyncpa [#allocation4], 0 }
   0x3   :  { %16 = vsyncadd [#allocation3], 96  ;;  %s629_s15 = smov [#allocation5]   ;;  %s535_s19 = scalar_lea.hbm %s755_s1, 256 }
   0x4   :  { %s29_s16 = sshll.u32 %s629_s15, 4  ;;  %p536_p0 = scmp.ne.s32.totalorder %s755_s1, %s535_s19  ;;  %s30_s16 = int_to_ptr.vmem [resolvable:$true] %s29_s16 }
   0x5   :  { %p539_p1 = scmp.lt.u32.totalorder %s535_s19, %s755_s1 }
   0x7   :  { %p541_p2 = pnand %p539_p1, %p536_p0 }
   0x9   :  { %544 = shalt.err (!%p541_p2)
}
   0xa   :  { %s545_s24 = scalar_lea.vmem %s30_s16, 256  ;;  %p550_p4 = scmp.lt.s32.totalorder %s30_s16, %s30_s16 }
   0xb   :  { %p546_p3 = scmp.ne.s32.totalorder %s30_s16, %s545_s24  ;;  %p551_p5 = scmp.lt.s32.totalorder %s545_s24, %s545_s24 }
   0xd   :  { %p552_p6 = por %p551_p5, %p550_p4 }
   0xf   :  { %p553_p7 = pnand %p552_p6, %p546_p3 }
  0x11   :  { %556 = shalt.err (!%p553_p7)
}
  0x12   :  { %s630_s25 = smov 128   ;;  %s631_s26 = smov 8  }
  0x13   :  { %35 = dma.hbm_to_vmem [thread:$0]  %s755_s1, 256, %s30_s16, [#allocation6], %s630_s25, %s630_s25, %s631_s26  }
  0x14   :  { %s632_s29 = smov [#allocation2]   ;;  %s557_s7 = scalar_lea.hbm %s754_s0, 32 }
  0x15   :  { %s17_s30 = sshll.u32 %s632_s29, 4  ;;  %p558_p8 = scmp.ne.s32.totalorder %s754_s0, %s557_s7  ;;  %s18_s30 = int_to_ptr.vmem [resolvable:$true] %s17_s30 }
  0x16   :  { %p561_p9 = scmp.lt.u32.totalorder %s557_s7, %s754_s0 }
  0x18   :  { %p563_p10 = pnand %p561_p9, %p558_p8 }
  0x1a   :  { %566 = shalt.err (!%p563_p10)
}
  0x1b   :  { %s567_s12 = scalar_lea.vmem %s18_s30, 32  ;;  %s571_s1 = scalar_lea.vmem %s18_s30, 128 }
  0x1c   :  { %p568_p11 = scmp.ne.s32.totalorder %s18_s30, %s567_s12  ;;  %p572_p12 = scmp.lt.s32.totalorder %s18_s30, %s18_s30 }
  0x1d   :  { %p573_p13 = scmp.lt.s32.totalorder %s571_s1, %s567_s12 }
  0x1f   :  { %p574_p0 = por %p573_p13, %p572_p12 }
  0x21   :  { %p575_p1 = pnand %p574_p0, %p568_p11 }
  0x23   :  { %578 = shalt.err (!%p575_p1)
}
  0x24   :  { %s633_s13 = smov 32   ;;  %s634_s14 = smov 2  }
  0x25   :  { %23 = dma.hbm_to_vmem [thread:$0]  %s754_s0, 32, %s18_s30, [#allocation3], %s633_s13, %s633_s13, %s634_s14  }
  0x26   :  { %s635_s17 = smov [#allocation7]   ;;  %s579_s21 = scalar_lea.hbm %s756_s2, 4096 }
  0x27   :  { %s41_s18 = sshll.u32 %s635_s17, 4  ;;  %p580_p2 = scmp.ne.s32.totalorder %s756_s2, %s579_s21  ;;  %s42_s18 = int_to_ptr.vmem [resolvable:$true] %s41_s18 }
  0x28   :  { %p583_p3 = scmp.lt.u32.totalorder %s579_s21, %s756_s2 }
  0x2a   :  { %p585_p4 = pnand %p583_p3, %p580_p2 }
  0x2c   :  { %588 = shalt.err (!%p585_p4)
}
  0x2d   :  { %s589_s28 = scalar_lea.vmem %s42_s18, 4096  ;;  %p594_p6 = scmp.lt.s32.totalorder %s42_s18, %s42_s18 }
  0x2e   :  { %p590_p5 = scmp.ne.s32.totalorder %s42_s18, %s589_s28  ;;  %p595_p7 = scmp.lt.s32.totalorder %s589_s28, %s589_s28 }
  0x30   :  { %p596_p8 = por %p595_p7, %p594_p6 }
  0x32   :  { %p597_p9 = pnand %p596_p8, %p590_p5 }
  0x34   :  { %600 = shalt.err (!%p597_p9)
}
  0x35   :  { %47 = dma.hbm_to_vmem [thread:$0]  %s756_s2, 4096, %s42_s18, [#allocation6], %s630_s25, %s630_s25, %s631_s26  }
  0x36   :  { %623 = dma.done.wait [#allocation3], 128  }
  0x37   :  { %624 = vsyncadd [#allocation3], 4294967168 }
  0x38   :  { %625 = dma.done.wait [#allocation6], 4352  }
  0x39   :  { %626 = vsyncadd [#allocation6], 4294962944  ;;  %v636_v0 = vmov 0.0|0.0   ;;  %vm637_vm0 = vmmov 0   ;;  %v638_v1 = vmov 0.0   ;;  %v60_v2 = vld [vmem:[#allocation5] sm:$0xff] }
  0x3a   :  { %473 = vmatprep.subr.bf16.mxu0 %v636_v0  ;;  %400 = vmatprep.mubr.msk.f32.mxu0 %vm637_vm0, %v638_v1  ;;  %v61_v3 = vld [vmem:[#allocation5 + $0x8] sm:$0xff]  ;;  %v144_v5 = vld [vmem:[#allocation7] sm:$0xff]  ;;  %v145_v6 = vld [vmem:[#allocation7 + $0x8] sm:$0xff]  ;;  %vm69_vm1 = vcmask 130048  }
  0x3b   :  { %476 = vmatprep.subr.bf16.mxu1 %v636_v0  ;;  %435 = vmatprep.mubr.msk.f32.mxu1 %vm637_vm0, %v638_v1  ;;  %v474_v4 = vpack.c.bf16 %v61_v3, %v60_v2  ;;  %v146_v7 = vld [vmem:[#allocation7 + $0x10] sm:$0xff]  ;;  %v477_v8 = vpack.c.bf16 %v145_v6, %v144_v5  ;;  %v147_v9 = vld [vmem:[#allocation7 + $0x18] sm:$0xff]  ;;  %v59_v10 = vld [vmem:[#allocation2] sm:$0xff] }
  0x3c   :  { %v480_v11 = vpack.c.bf16 %v147_v9, %v146_v7  ;;  %v148_v12 = vld [vmem:[#allocation7 + $0x20] sm:$0xff]  ;;  %v149_v13 = vld [vmem:[#allocation7 + $0x28] sm:$0xff]  ;;  %v150_v15 = vld [vmem:[#allocation7 + $0x30] sm:$0xff] }
  0x3d   :  { %475 = vmatpush3.bf16.msra.mxu0 %v474_v4  ;;  %478 = vmatpush3.bf16.msra.mxu1 %v477_v8  ;;  %v483_v14 = vpack.c.bf16 %v149_v13, %v148_v12  ;;  %v151_v16 = vld [vmem:[#allocation7 + $0x38] sm:$0xff]  ;;  %v152_v18 = vld [vmem:[#allocation7 + $0x40] sm:$0xff]  ;;  %v153_v19 = vld [vmem:[#allocation7 + $0x48] sm:$0xff] }
  0x3e   :  { %500 = vmatprep.subr.bf16.mxu0 %v636_v0  ;;  %479 = vmatprep.subr.bf16.mxu1 %v636_v0  ;;  %v486_v17 = vpack.c.bf16 %v151_v16, %v150_v15  ;;  %v489_v20 = vpack.c.bf16 %v153_v19, %v152_v18  ;;  %v154_v21 = vld [vmem:[#allocation7 + $0x50] sm:$0xff]  ;;  %v155_v22 = vld [vmem:[#allocation7 + $0x58] sm:$0xff]  ;;  %v156_v24 = vld [vmem:[#allocation7 + $0x60] sm:$0xff] }
  0x3f   :  { %v492_v23 = vpack.c.bf16 %v155_v22, %v154_v21  ;;  %v157_v25 = vld [vmem:[#allocation7 + $0x68] sm:$0xff]  ;;  %v158_v27 = vld [vmem:[#allocation7 + $0x70] sm:$0xff]  ;;  %v159_v28 = vld [vmem:[#allocation7 + $0x78] sm:$0xff] }
  0x40   :  { %401 = vmatmul.mubr.msk.f32.vlgmr.msra.gmra.mrb[0].mxu0 %vm69_vm1, %v59_v10  ;;  %v495_v26 = vpack.c.bf16 %v157_v25, %v156_v24  ;;  %v498_v29 = vpack.c.bf16 %v159_v28, %v158_v27  ;;  %v240_v30 = vld [vmem:[#allocation7 + $0x80] sm:$0xff]  ;;  %v241_v31 = vld [vmem:[#allocation7 + $0x88] sm:$0xff]  ;;  %v242_v32 = vld [vmem:[#allocation7 + $0x90] sm:$0xff] }
  0x41   :  { %470 = vmatprep.mubr.msk.f32.mxu0 %vm637_vm0, %v638_v1  ;;  %481 = vmatpush3.bf16.msra.mxu1 %v480_v11  ;;  %v501_v33 = vpack.c.bf16 %v241_v31, %v240_v30  ;;  %v243_v34 = vld [vmem:[#allocation7 + $0x98] sm:$0xff]  ;;  %v244_v36 = vld [vmem:[#allocation7 + $0xa0] sm:$0xff]  ;;  %v245_v37 = vld [vmem:[#allocation7 + $0xa8] sm:$0xff] }
  0x42   :  { %482 = vmatprep.subr.bf16.mxu1 %v636_v0  ;;  %v504_v35 = vpack.c.bf16 %v243_v34, %v242_v32  ;;  %v507_v38 = vpack.c.bf16 %v245_v37, %v244_v36  ;;  %v246_v39 = vld [vmem:[#allocation7 + $0xb0] sm:$0xff]  ;;  %v247_v40 = vld [vmem:[#allocation7 + $0xb8] sm:$0xff]  ;;  %v248_v42 = vld [vmem:[#allocation7 + $0xc0] sm:$0xff] }
  0x43   :  { %502 = vmatpush3.bf16.msra.mxu0 %v501_v33  ;;  %v510_v41 = vpack.c.bf16 %v247_v40, %v246_v39  ;;  %v249_v43 = vld [vmem:[#allocation7 + $0xc8] sm:$0xff]  ;;  %v250_v45 = vld [vmem:[#allocation7 + $0xd0] sm:$0xff]  ;;  %v251_v46 = vld [vmem:[#allocation7 + $0xd8] sm:$0xff] }
  0x44   :  { %503 = vmatprep.subr.bf16.mxu0 %v636_v0  ;;  %v513_v44 = vpack.c.bf16 %v249_v43, %v248_v42  ;;  %v516_v47 = vpack.c.bf16 %v251_v46, %v250_v45  ;;  %v252_v48 = vld [vmem:[#allocation7 + $0xe0] sm:$0xff]  ;;  %v253_v49 = vld [vmem:[#allocation7 + $0xe8] sm:$0xff]  ;;  %v254_v56 = vld [vmem:[#allocation7 + $0xf0] sm:$0xff] }
  0x45   :  { %484 = vmatpush3.bf16.msra.mxu1 %v483_v14  ;;  %v519_v50 = vpack.c.bf16 %v253_v49, %v252_v48  ;;  %v353_v51 = vld [vmem:[%s757_s3] ss:$0 sm:$0xff]  ;;  %v255_v57 = vld [vmem:[#allocation7 + $0xf8] sm:$0xff]  ;;  %v356_v59 = vld [vmem:[%s757_s3 + $0x1] ss:$0 sm:$0xff] }
  0x46   :  { %485 = vmatprep.subr.bf16.mxu1 %v636_v0  ;;  %v522_v58 = vpack.c.bf16 %v255_v57, %v254_v56 }
  0x47   :  { %505 = vmatpush3.bf16.msra.mxu0 %v504_v35 }
  0x48   :  { %506 = vmatprep.subr.bf16.mxu0 %v636_v0 }
  0x49   :  { %487 = vmatpush3.bf16.msra.mxu1 %v486_v17 }
  0x4a   :  { %488 = vmatprep.subr.bf16.mxu1 %v636_v0 }
  0x4b   :  { %508 = vmatpush3.bf16.msra.mxu0 %v507_v38 }
  0x4c   :  { %509 = vmatprep.subr.bf16.mxu0 %v636_v0 }
  0x4d   :  { %490 = vmatpush3.bf16.msra.mxu1 %v489_v20 }
  0x4e   :  { %491 = vmatprep.subr.bf16.mxu1 %v636_v0 }
  0x4f   :  { %511 = vmatpush3.bf16.msra.mxu0 %v510_v41 }
  0x50   :  { %512 = vmatprep.subr.bf16.mxu0 %v636_v0 }
  0x51   :  { %493 = vmatpush3.bf16.msra.mxu1 %v492_v23 }
  0x52   :  { %494 = vmatprep.subr.bf16.mxu1 %v636_v0 }
  0x53   :  { %514 = vmatpush3.bf16.msra.mxu0 %v513_v44 }
  0x54   :  { %515 = vmatprep.subr.bf16.mxu0 %v636_v0 }
  0x55   :  { %496 = vmatpush3.bf16.msra.mxu1 %v495_v26 }
  0x56   :  { %497 = vmatprep.subr.bf16.mxu1 %v636_v0 }
  0x57   :  { %517 = vmatpush3.bf16.msra.mxu0 %v516_v47 }
  0x58   :  { %518 = vmatprep.subr.bf16.mxu0 %v636_v0 }
  0x59   :  { %499 = vmatpush3.bf16.msra.mxu1 %v498_v29 }
  0x5b   :  { %520 = vmatpush3.bf16.msra.mxu0 %v519_v50 }
  0x5c   :  { %521 = vmatprep.subr.bf16.mxu0 %v636_v0  ;;  %v358_v0 = vld [vmem:[%s757_s3 + $0x2] ss:$0 sm:$0xff] }
  0x5f   :  { %523 = vmatpush3.bf16.msra.mxu0 %v522_v58 }
 0x113   :  { %v139_v52 = vpop.f32.mrb[0].mxu0 }
 0x114   :  { %v140_v53 = vadd.f32 %v353_v51, %v139_v52  ;;  %v402_v54 = vpop.f32.mrb[1].mxu0 }
 0x116   :  { %v143_v55 = vmax.f32 %v140_v53, 0.0 }
 0x118   :  { %436 = vmatmul.mubr.f32.vlgmr.msra.gmra.mrb[0].mxu1 %v143_v55 }
 0x1eb   :  { %v234_v60 = vpop.f32.mrb[0].mxu1 }
 0x1ec   :  { %v235_v61 = vadd.f32 %v356_v59, %v234_v60  ;;  %v437_v62 = vpop.f32.mrb[1].mxu1 }
 0x1ee   :  { %v238_v63 = vmax.f32 %v235_v61, 0.0 }
 0x1f0   :  { %471 = vmatmul.mubr.f32.vlgmr.msra.gmra.mrb[2].mxu0 %v238_v63 }
 0x2c3   :  { %v330_v1 = vpop.f32.mrb[2].mxu0 }
 0x2c4   :  { %v331_v2 = vadd.f32 %v358_v0, %v330_v1  ;;  %v472_v3 = vpop.f32.mrb[3].mxu0 }
 0x2c6   :  { %334 = vst [vmem:[#allocation8] sm:$0xff] %v331_v2 }
 0x2c7   :  { %339 = vsyncadd [#allocation4], 96  ;;  %s639_s7 = smov [#allocation8]  }
 0x2c8   :  { %s340_s8 = sshll.u32 %s639_s7, 4  ;;  %s341_s8 = int_to_ptr.vmem [resolvable:$true] %s340_s8 }
 0x2c9   :  { %s601_s9 = scalar_lea.vmem %s341_s8, 32  ;;  %s605_s10 = scalar_lea.vmem %s341_s8, 128 }
 0x2ca   :  { %p602_p10 = scmp.ne.s32.totalorder %s341_s8, %s601_s9  ;;  %p606_p11 = scmp.lt.s32.totalorder %s341_s8, %s341_s8 }
 0x2cb   :  { %p607_p12 = scmp.lt.s32.totalorder %s605_s10, %s601_s9 }
 0x2cd   :  { %p608_p13 = por %p607_p12, %p606_p11 }
 0x2cf   :  { %p609_p0 = pnand %p608_p13, %p602_p10 }
 0x2d1   :  { %612 = shalt.err (!%p609_p0)
}
 0x2d2   :  { %s613_s3 = scalar_lea.hbm %s758_s4, 32 }
 0x2d3   :  { %p614_p1 = scmp.ne.s32.totalorder %s758_s4, %s613_s3  ;;  %p617_p2 = scmp.lt.u32.totalorder %s613_s3, %s758_s4 }
 0x2d5   :  { %p619_p3 = pnand %p617_p2, %p614_p1 }
 0x2d7   :  { %622 = shalt.err (!%p619_p3)
}
 0x2d8   :  { %346 = dma.vmem_to_hbm [thread:$0]  %s341_s8, 32, %s758_s4, [#allocation4], %s633_s13, %s633_s13, %s634_s14  }
 0x2d9   :  { %627 = dma.done.wait [#allocation4], 128  }
 0x2da   :  { %628 = vsyncadd [#allocation4], 4294967168 }
 0x2db   :  { %350 = vsyncpa [#allocation3], 1 }
 0x2dc   :  { %351 = vsyncpa [#allocation6], 1 }
 0x2dd   :  { %352 = vsyncpa [#allocation4], 1 }

</bundles_post_ra>
